<compile_context>
chip_gen: v7x
topology: tpu7x:2x2x1
jax: 0.10.0
libtpu: 0.0.40
codegen_flags: <defaults>
</compile_context>

<pallas_src>
import jax
import jax.numpy as jnp
from jax.experimental import pallas as pl
from jax.experimental.pallas import tpu as pltpu


def _scaled_copy_kernel(x_ref, s_ref, o_ref):
    """out = x * s  (s is a per-row scale broadcast across the lane dim)."""
    o_ref[...] = x_ref[...] * s_ref[...]


def _sublane_multiple(dtype):
    """Dtype-specific sublane packing multiple: 8 f32, 16 bf16, 32 int8/fp8."""
    itemsize = jnp.dtype(dtype).itemsize
    return max(8, 32 // max(1, itemsize))


def _choose_tiles(nc, hw, dtype, target_tile_bytes=4 << 20):
    """Pick (row_tile, lane_tile) so the x tile is ~target_tile_bytes."""
    itemsize = jnp.dtype(dtype).itemsize
    sub = _sublane_multiple(dtype)

    # Lane (HW) tile: multiple of 128, capped so even a minimal-row block stays
    # within the byte budget (protects VMEM for very large feature maps).
    if hw % 128 == 0:
        max_lanes = max(128, ((target_tile_bytes // (sub * itemsize)) // 128) * 128)
        tw = min(hw, max_lanes)
    else:
        # Full last dim is always a legal block shape, but lanes < 128 produce
        # masked partial stores.
        # TODO(synk): pad HW to a multiple of 128 (or use plain XLA fusion) for
        # small non-aligned feature maps like 7x7.
        tw = hw

    # Row (channel) tile: multiple of the sublane packing factor, or full NC.
    rows = max(1, target_tile_bytes // max(1, tw * itemsize))
    rows = max(sub, (rows // sub) * sub)
    if rows >= nc:
        rows = nc
    return rows, tw


def _ensure_multi_step(nc, hw, tr, tw, dtype, min_bytes=1 << 20):
    """If the grid would be a single step on a big problem, split it so v7x's
    two TensorCores can both stream (pure perf; irrelevant on v5e/v6e)."""
    itemsize = jnp.dtype(dtype).itemsize
    if pl.cdiv(nc, tr) * pl.cdiv(hw, tw) > 1:
        return tr, tw
    if nc * hw * itemsize < min_bytes:
        return tr, tw  # too small for the extra grid step to pay off
    sub = _sublane_multiple(dtype)
    if nc >= 2 * sub:
        tr = max(sub, ((nc // 2) // sub) * sub)
    elif hw % 128 == 0 and hw >= 256:
        tw = max(128, ((hw // 2) // 128) * 128)
    return tr, tw


def model_forward(x, key, p=0.5):
    """JAX/Pallas equivalent of Model.forward (training-mode dropout2d)."""
    assert p < 1.0, "p == 1.0 would produce inf scale; not supported here"
    n, c, h, w = x.shape
    nc = n * c
    hw = h * w
    itemsize = int(jnp.dtype(x.dtype).itemsize)

    k1, k2 = jax.random.split(key)
    # dropout2d drops whole (n, c) channels independently with prob p and
    # scales kept channels by 1/(1-p).  Fuse both dropouts + the add into one
    # per-channel scale (computed in f32, cast once to x.dtype).
    keep1 = jax.random.bernoulli(k1, 1.0 - p, (nc, 1)).astype(jnp.float32)
    keep2 = jax.random.bernoulli(k2, 1.0 - p, (nc, 1)).astype(jnp.float32)
    inv_keep = jnp.float32(1.0 / (1.0 - p))
    s1 = keep1 * inv_keep
    s2 = keep2 * inv_keep
    s = ((1.0 + s1) * s2).astype(x.dtype)  # (NC, 1), values in {0, 1/(1-p)+...}

    x2d = x.reshape(nc, hw)

    tr, tw = _choose_tiles(nc, hw, x.dtype)
    tr, tw = _ensure_multi_step(nc, hw, tr, tw, x.dtype)
    grid = (pl.cdiv(nc, tr), pl.cdiv(hw, tw))

    out2d = pl.pallas_call(
        _scaled_copy_kernel,
        out_shape=jax.ShapeDtypeStruct((nc, hw), x.dtype),
        grid=grid,
        in_specs=[
            # Lane-dense x tile.
            pl.BlockSpec((tr, tw), lambda i, j: (i, j)),
            # Per-row fused scale; index map is j-invariant so it is not
            # re-fetched while sweeping the lane axis.
            pl.BlockSpec((tr, 1), lambda i, j: (i, 0)),
        ],
        out_specs=pl.BlockSpec((tr, tw), lambda i, j: (i, j)),
        compiler_params=pltpu.CompilerParams(
            dimension_semantics=("parallel", "parallel"),
            # Explicit limit so 2x(in+out) double-buffered ~4 MiB tiles also
            # fit under v5e's 16 MiB scoped default; well within physical VMEM
            # on v5e/v6e (128 MiB) and v7x (64 MiB).
            vmem_limit_bytes=32 << 20,
        ),
        cost_estimate=pl.CostEstimate(
            flops=nc * hw,
            transcendentals=0,
            bytes_accessed=2 * nc * hw * itemsize + nc * itemsize,
        ),
    )(x2d, s)

    return out2d.reshape(n, c, h, w)


if __name__ == "__main__":
    key = jax.random.PRNGKey(0)
    kx, kdrop = jax.random.split(key)

    # Small NCHW shape consistent with the module's 4-D (dropout2d) input.
    x = jax.random.normal(kx, (2, 4, 16, 16), dtype=jnp.float32)

    out = model_forward(x, kdrop, p=0.5)
    out = jax.block_until_ready(out)

    # Sanity checks: shape/dtype preserved; every (n, c) channel is either
    # all-zero (dropped by the second dropout) or an exact per-channel scaling
    # of x with scale in {2, 6} = (1 + {0, 2}) * 2 for p=0.5.
    assert out.shape == x.shape and out.dtype == x.dtype
    nc = x.shape[0] * x.shape[1]
    out2d = out.reshape(nc, -1)
    x2d = x.reshape(nc, -1)
    for r in range(nc):
        row = out2d[r]
        xr = x2d[r]
        ok = (
            bool(jnp.all(row == 0.0))
            or bool(jnp.allclose(row, 2.0 * xr, atol=1e-5))
            or bool(jnp.allclose(row, 6.0 * xr, atol=1e-5))
        )
        assert ok, f"unexpected per-channel scale in row {r}"

    print("KERNEL_OK")
</pallas_src>

<mosaic_0001>
module attributes {stable_mosaic.version = 11 : i64} {
  func.func @_scaled_copy_kernel(%arg0: i32, %arg1: i32, %arg2: memref<8x256xf32, #tpu.memory_space<vmem>>, %arg3: memref<8x1xf32, #tpu.memory_space<vmem>>, %arg4: memref<8x256xf32, #tpu.memory_space<vmem>>) attributes {dimension_semantics = [#tpu.dimension_semantics<parallel>, #tpu.dimension_semantics<parallel>], iteration_bounds = array<i64: 1, 1>, scalar_prefetch = 0 : i64, scratch_operands = 0 : i64, tpu.core_type = #tpu.core_type<tc>, window_params = [{transform_indices = @transform_0, window_bounds = array<i64: 8, 256>}, {transform_indices = @transform_1, window_bounds = array<i64: 8, 1>}, {transform_indices = @transform_2, window_bounds = array<i64: 8, 256>}]} {
    %c0 = arith.constant 0 : index
    %c0_0 = arith.constant 0 : index
    %0 = vector.load %arg2[%c0, %c0_0] : memref<8x256xf32, #tpu.memory_space<vmem>>, vector<8x256xf32>
    %c0_1 = arith.constant 0 : index
    %c0_2 = arith.constant 0 : index
    %1 = vector.load %arg3[%c0_1, %c0_2] : memref<8x1xf32, #tpu.memory_space<vmem>>, vector<8x1xf32>
    %2 = vector.broadcast %1 : vector<8x1xf32> to vector<8x256xf32>
    %3 = arith.mulf %0, %2 : vector<8x256xf32>
    %c0_3 = arith.constant 0 : index
    %c0_4 = arith.constant 0 : index
    %4 = vector.load %arg4[%c0_3, %c0_4] : memref<8x256xf32, #tpu.memory_space<vmem>>, vector<8x256xf32>
    tpu.vector_store %arg4[%c0_3, %c0_4], %3 {strides = array<i32>} : memref<8x256xf32, #tpu.memory_space<vmem>>, vector<8x256xf32>,
    return
  }
  func.func @transform_0(%arg0: i32, %arg1: i32) -> (i32, i32) {
    %c0_i32 = arith.constant 0 : i32
    return %arg0, %arg1 : i32, i32
  }
  func.func @transform_1(%arg0: i32, %arg1: i32) -> (i32, i32) {
    %c0_i32 = arith.constant 0 : i32
    %c0_i32_0 = arith.constant 0 : i32
    return %arg0, %c0_i32 : i32, i32
  }
  func.func @transform_2(%arg0: i32, %arg1: i32) -> (i32, i32) {
    %c0_i32 = arith.constant 0 : i32
    return %arg0, %arg1 : i32, i32
  }
}

</mosaic_0001>

<bundles_post_ra>
// kernel: tpu_custom_call.1
= control target key start
LH: loop header
LB: loop body
LE: loop exit
PB: predicated region body
PF: predicated region fallthrough
CT: control target
= control target key end

     0   :  { %7 = vsyncpa [#allocation3], 0  ;;  %s148_s0 = inlined_call_operand.hbm [shape: f32[8,256], index: 0, kind: input, shape index: {}]   ;;  %s149_s1 = inlined_call_operand.vmem [shape: f32[8,1], index: 1, kind: input, shape index: {}]   ;;  %s150_s2 = inlined_call_operand.hbm [shape: f32[8,256], index: 2, kind: output, shape index: {}]  }
   0x1   :  { %8 = vsyncpa [#allocation4], 0  ;;  %s103_s9 = smov [#allocation2]   ;;  %s55_s13 = scalar_lea.hbm %s148_s0, 256 }
   0x2   :  { %s15_s10 = sshll.u32 %s103_s9, 4  ;;  %p56_p0 = scmp.ne.s32.totalorder %s148_s0, %s55_s13  ;;  %s16_s10 = int_to_ptr.vmem [resolvable:$true] %s15_s10 }
   0x3   :  { %p59_p1 = scmp.lt.u32.totalorder %s55_s13, %s148_s0 }
   0x5   :  { %p61_p2 = pnand %p59_p1, %p56_p0 }
   0x7   :  { %64 = shalt.err (!%p61_p2)
}
   0x8   :  { %s65_s18 = scalar_lea.vmem %s16_s10, 256  ;;  %p70_p4 = scmp.lt.s32.totalorder %s16_s10, %s16_s10 }
   0x9   :  { %p66_p3 = scmp.ne.s32.totalorder %s16_s10, %s65_s18  ;;  %p71_p5 = scmp.lt.s32.totalorder %s65_s18, %s65_s18 }
   0xb   :  { %p72_p6 = por %p71_p5, %p70_p4 }
   0xd   :  { %p73_p7 = pnand %p72_p6, %p66_p3 }
   0xf   :  { %76 = shalt.err (!%p73_p7)
}
  0x10   :  { %18 = dma.hbm_to_vmem [thread:$0]  %s148_s0, 256, %s16_s10, [#allocation3]  }
  0x11   :  { %99 = dma.done.wait [#allocation3], 256  }
  0x12   :  { %100 = vsyncadd [#allocation3], 4294967040  ;;  %v104_v0 = vmov 0   ;;  %v26_v1 = vld [vmem:[%s149_s1] sm:$0xff]  ;;  %v25_v3 = vld [vmem:[#allocation2 + $0x8] sm:$0xff]  ;;  %s105_s23 = smov [#allocation5]  }
  0x13   :  { %54 = vset.pattern.permute.xlu0 %v104_v0  ;;  %v24_v2 = vld [vmem:[#allocation2] sm:$0xff]  ;;  %s42_s24 = sshll.u32 %s105_s23, 4  ;;  %s43_s24 = int_to_ptr.vmem [resolvable:$true] %s42_s24 }
  0x14   :  { %29 = vperm.xlu0 %54, %v26_v1   ;;  %s77_s0 = scalar_lea.vmem %s43_s24, 256  ;;  %p82_p9 = scmp.lt.s32.totalorder %s43_s24, %s43_s24 }
  0x15   :  { %p78_p8 = scmp.ne.s32.totalorder %s43_s24, %s77_s0  ;;  %p83_p10 = scmp.lt.s32.totalorder %s77_s0, %s77_s0 }
  0x17   :  { %p84_p11 = por %p83_p10, %p82_p9 }
  0x19   :  { %p85_p12 = pnand %p84_p11, %p78_p8 }
  0x93   :  { %v30_v4 = vpop.permute.xlu0 %29 }
  0x94   :  { %v32_v5 = vmul.f32 %v30_v4, %v24_v2  ;;  %v33_v6 = vmul.f32 %v30_v4, %v25_v3 }
  0x96   :  { %34 = vst [vmem:[#allocation5] sm:$0xff] %v32_v5  ;;  %35 = vst [vmem:[#allocation5 + $0x8] sm:$0xff] %v33_v6 }
  0x97   :  { %88 = shalt.err (!%p85_p12)
}
  0x98   :  { %s89_s26 = scalar_lea.hbm %s150_s2, 256 }
  0x99   :  { %p90_p13 = scmp.ne.s32.totalorder %s150_s2, %s89_s26  ;;  %p93_p0 = scmp.lt.u32.totalorder %s89_s26, %s150_s2 }
  0x9b   :  { %p95_p1 = pnand %p93_p0, %p90_p13 }
  0x9d   :  { %98 = shalt.err (!%p95_p1)
}
  0x9e   :  { %45 = dma.vmem_to_hbm [thread:$0]  %s43_s24, 256, %s150_s2, [#allocation4]  }
  0x9f   :  { %101 = dma.done.wait [#allocation4], 256  }
  0xa0   :  { %102 = vsyncadd [#allocation4], 4294967040 }
  0xa1   :  { %49 = vsyncpa [#allocation3], 1 }
  0xa2   :  { %50 = vsyncpa [#allocation4], 1 }

</bundles_post_ra>
